<compile_context>
chip_gen: v7x
topology: tpu7x:2x2x1
jax: 0.10.0
libtpu: 0.0.40
codegen_flags: <defaults>
</compile_context>

<pallas_src>
import jax
import jax.numpy as jnp
from jax.experimental import pallas as pl
from jax.experimental.pallas import tpu as pltpu


def _round_up(n, m):
    return ((n + m - 1) // m) * m


def _choose_tb(B, tb_max):
    """Batch tile: multiple of 128 (lane axis), bounded padding waste."""
    tb_max = max(128, _round_up(tb_max, 128))
    if B <= tb_max:
        return _round_up(B, 128)               # single grid step
    n_steps = -(-B // tb_max)                  # ceil
    return _round_up(-(-B // n_steps), 128)    # <= tb_max, balances steps


def mlp_kernel(x_ref, w1_ref, b1_ref, w2_ref, b2_ref,
               w3_ref, b3_ref, w4_ref, b4_ref, o_ref):
    # Layer 1: K=1 "matmul" -> VPU broadcast multiply (f32, v5e-safe).
    #   w1: (128, 1) f32, x: (1, TB) f32  ->  h: (128, TB) f32
    h = jnp.maximum(w1_ref[...] * x_ref[...] + b1_ref[...], 0.0)

    # Layers 2-4: MXU matmuls, bf16 inputs, f32 accumulation.
    # Bias add / ReLU stay f32 on the VPU.
    h = jnp.dot(w2_ref[...], h.astype(jnp.bfloat16),
                preferred_element_type=jnp.float32) + b2_ref[...]   # (64, TB)
    h = jnp.maximum(h, 0.0)
    h = jnp.dot(w3_ref[...], h.astype(jnp.bfloat16),
                preferred_element_type=jnp.float32) + b3_ref[...]   # (32, TB)
    h = jnp.maximum(h, 0.0)
    out = jnp.dot(w4_ref[...], h.astype(jnp.bfloat16),
                  preferred_element_type=jnp.float32) + b4_ref[...]  # (4, TB)
    o_ref[...] = out.astype(o_ref.dtype)       # lane-dense (4, TB) store


def parameter_estimation_nn(x, params, *, tb=4096):
    """x: [B, 1] float32 -> [B, 4] float32 (same forward as the PyTorch module)."""
    (w1, b1), (w2, b2), (w3, b3), (w4, b4) = params
    B = x.shape[0]

    TB = _choose_tb(B, tb)
    B_pad = _round_up(B, TB)
    x = x.astype(jnp.float32)
    if B_pad != B:
        x = jnp.pad(x, ((0, B_pad - B), (0, 0)))
    x_row = x.reshape(1, B_pad)                 # lane-major batch

    # Prepare weights ONCE in the wrapper (kernel consumes (out, in) layout):
    #   layer 1 stays f32 (VPU broadcast), layers 2-4 cast to bf16 for the MXU,
    #   all biases are (out, 1) f32 columns (broadcast along lanes).
    w1p = w1.reshape(128, 1).astype(jnp.float32)
    b1p = b1.reshape(128, 1).astype(jnp.float32)
    w2p = w2.T.astype(jnp.bfloat16)             # (64, 128)
    b2p = b2.reshape(64, 1).astype(jnp.float32)
    w3p = w3.T.astype(jnp.bfloat16)             # (32, 64)
    b3p = b3.reshape(32, 1).astype(jnp.float32)
    w4p = w4.T.astype(jnp.bfloat16)             # (4, 32) -- no zero-padding
    b4p = b4.reshape(4, 1).astype(jnp.float32)

    grid = (B_pad // TB,)
    const = lambda i: (0, 0)   # weights/biases: same block every step -> resident

    flops_per_row = 2 * (128 + 128 * 64 + 64 * 32 + 32 * 4)
    weight_bytes = (w1p.size * 4 + b1p.size * 4 + w2p.size * 2 + b2p.size * 4 +
                    w3p.size * 2 + b3p.size * 4 + w4p.size * 2 + b4p.size * 4)
    cost = pl.CostEstimate(
        flops=int(B_pad * flops_per_row),
        transcendentals=0,
        bytes_accessed=int(4 * B_pad * (1 + 4) + weight_bytes),
    )

    out_t = pl.pallas_call(
        mlp_kernel,
        out_shape=jax.ShapeDtypeStruct((4, B_pad), jnp.float32),
        grid=grid,
        in_specs=[
            pl.BlockSpec((1, TB), lambda i: (0, i)),    # x: tiled over batch (lanes)
            pl.BlockSpec((128, 1), const),              # w1 (f32)
            pl.BlockSpec((128, 1), const),              # b1
            pl.BlockSpec((64, 128), const),             # w2 (bf16)
            pl.BlockSpec((64, 1), const),               # b2
            pl.BlockSpec((32, 64), const),              # w3 (bf16)
            pl.BlockSpec((32, 1), const),               # b3
            pl.BlockSpec((4, 32), const),               # w4 (bf16)
            pl.BlockSpec((4, 1), const),                # b4
        ],
        out_specs=pl.BlockSpec((4, TB), lambda i: (0, i)),
        compiler_params=pltpu.CompilerParams(
            dimension_semantics=("parallel",),
            vmem_limit_bytes=32 * 1024 * 1024,
        ),
        cost_estimate=cost,
    )(x_row, w1p, b1p, w2p, b2p, w3p, b3p, w4p, b4p)

    return out_t[:, :B].T                              # (B, 4)


def init_params(key):
    """Deterministic init mimicking PyTorch's default Linear init
    (uniform(-1/sqrt(fan_in), 1/sqrt(fan_in))). Weights stored as (in, out)."""
    dims = [(1, 128), (128, 64), (64, 32), (32, 4)]
    params = []
    for (fan_in, fan_out) in dims:
        key, kw, kb = jax.random.split(key, 3)
        bound = 1.0 / (fan_in ** 0.5)
        w = jax.random.uniform(kw, (fan_in, fan_out), jnp.float32,
                               minval=-bound, maxval=bound)
        b = jax.random.uniform(kb, (1, fan_out), jnp.float32,
                               minval=-bound, maxval=bound)
        params.append((w, b))
    return params


def reference_forward_f32(x, params):
    h = x
    for i, (w, b) in enumerate(params):
        h = h @ w + b
        if i < len(params) - 1:
            h = jnp.maximum(h, 0.0)
    return h


def reference_forward_mirrored(x, params):
    """Pure-JAX reference mirroring the kernel's transposed math exactly
    (f32 layer-1 broadcast, bf16 MXU inputs, f32 accumulation)."""
    (w1, b1), (w2, b2), (w3, b3), (w4, b4) = params
    hT = jnp.maximum(w1.reshape(128, 1) * x.reshape(1, -1) + b1.reshape(128, 1), 0.0)
    hT = jnp.maximum(
        jnp.dot(w2.T.astype(jnp.bfloat16), hT.astype(jnp.bfloat16),
                preferred_element_type=jnp.float32) + b2.reshape(64, 1), 0.0)
    hT = jnp.maximum(
        jnp.dot(w3.T.astype(jnp.bfloat16), hT.astype(jnp.bfloat16),
                preferred_element_type=jnp.float32) + b3.reshape(32, 1), 0.0)
    outT = jnp.dot(w4.T.astype(jnp.bfloat16), hT.astype(jnp.bfloat16),
                   preferred_element_type=jnp.float32) + b4.reshape(4, 1)
    return outT.T


if __name__ == "__main__":
    key = jax.random.PRNGKey(0)
    kx, kp = jax.random.split(key)

    B = 100   # deliberately not a multiple of 8/128 to exercise the padding path
    x = jax.random.normal(kx, (B, 1), jnp.float32)
    params = init_params(kp)

    out = parameter_estimation_nn(x, params)
    out = jax.block_until_ready(out)
    assert out.shape == (B, 4), out.shape

    # Primary correctness check: mirror of the kernel's bf16-MXU math.
    ref_mirror = reference_forward_mirrored(x, params)
    assert jnp.allclose(out, ref_mirror, atol=1e-3, rtol=1e-3), (
        "mismatch vs bf16-mirrored reference: "
        f"max abs err = {float(jnp.max(jnp.abs(out - ref_mirror)))}")

    # Sanity check vs the full-f32 PyTorch-equivalent forward (loose tol for
    # the bf16 matmul inputs).
    ref_f32 = reference_forward_f32(x, params)
    assert jnp.allclose(out, ref_f32, atol=5e-2, rtol=5e-2), (
        "mismatch vs f32 reference: "
        f"max abs err = {float(jnp.max(jnp.abs(out - ref_f32)))}")

    print("KERNEL_OK")
</pallas_src>

<mosaic_0001>
module attributes {stable_mosaic.version = 11 : i64} {
  func.func @mlp_kernel(%arg0: i32, %arg1: memref<1x128xf32, #tpu.memory_space<vmem>>, %arg2: memref<128x1xf32, #tpu.memory_space<vmem>>, %arg3: memref<128x1xf32, #tpu.memory_space<vmem>>, %arg4: memref<64x128xbf16, #tpu.memory_space<vmem>>, %arg5: memref<64x1xf32, #tpu.memory_space<vmem>>, %arg6: memref<32x64xbf16, #tpu.memory_space<vmem>>, %arg7: memref<32x1xf32, #tpu.memory_space<vmem>>, %arg8: memref<4x32xbf16, #tpu.memory_space<vmem>>, %arg9: memref<4x1xf32, #tpu.memory_space<vmem>>, %arg10: memref<4x128xf32, #tpu.memory_space<vmem>>) attributes {dimension_semantics = [#tpu.dimension_semantics<parallel>], iteration_bounds = array<i64: 1>, scalar_prefetch = 0 : i64, scratch_operands = 0 : i64, tpu.core_type = #tpu.core_type<tc>, window_params = [{transform_indices = @transform_0, window_bounds = array<i64: 1, 128>}, {pipeline_mode = #tpu.pipeline_mode<synchronous>, transform_indices = @transform_1, window_bounds = array<i64: 128, 1>}, {pipeline_mode = #tpu.pipeline_mode<synchronous>, transform_indices = @transform_2, window_bounds = array<i64: 128, 1>}, {pipeline_mode = #tpu.pipeline_mode<synchronous>, transform_indices = @transform_3, window_bounds = array<i64: 64, 128>}, {pipeline_mode = #tpu.pipeline_mode<synchronous>, transform_indices = @transform_4, window_bounds = array<i64: 64, 1>}, {pipeline_mode = #tpu.pipeline_mode<synchronous>, transform_indices = @transform_5, window_bounds = array<i64: 32, 64>}, {pipeline_mode = #tpu.pipeline_mode<synchronous>, transform_indices = @transform_6, window_bounds = array<i64: 32, 1>}, {pipeline_mode = #tpu.pipeline_mode<synchronous>, transform_indices = @transform_7, window_bounds = array<i64: 4, 32>}, {pipeline_mode = #tpu.pipeline_mode<synchronous>, transform_indices = @transform_8, window_bounds = array<i64: 4, 1>}, {transform_indices = @transform_9, window_bounds = array<i64: 4, 128>}]} {
    %c0 = arith.constant 0 : index
    %c0_0 = arith.constant 0 : index
    %0 = vector.load %arg2[%c0, %c0_0] : memref<128x1xf32, #tpu.memory_space<vmem>>, vector<128x1xf32>
    %c0_1 = arith.constant 0 : index
    %c0_2 = arith.constant 0 : index
    %1 = vector.load %arg1[%c0_1, %c0_2] : memref<1x128xf32, #tpu.memory_space<vmem>>, vector<1x128xf32>
    %2 = vector.broadcast %0 : vector<128x1xf32> to vector<128x128xf32>
    %3 = vector.broadcast %1 : vector<1x128xf32> to vector<128x128xf32>
    %4 = arith.mulf %2, %3 : vector<128x128xf32>
    %c0_3 = arith.constant 0 : index
    %c0_4 = arith.constant 0 : index
    %5 = vector.load %arg3[%c0_3, %c0_4] : memref<128x1xf32, #tpu.memory_space<vmem>>, vector<128x1xf32>
    %6 = vector.broadcast %5 : vector<128x1xf32> to vector<128x128xf32>
    %7 = arith.addf %4, %6 : vector<128x128xf32>
    %cst = arith.constant 0.000000e+00 : f32
    %8 = vector.broadcast %cst : f32 to vector<128x128xf32>
    %9 = arith.maximumf %7, %8 : vector<128x128xf32>
    %c0_5 = arith.constant 0 : index
    %c0_6 = arith.constant 0 : index
    %10 = vector.load %arg4[%c0_5, %c0_6] : memref<64x128xbf16, #tpu.memory_space<vmem>>, vector<64x128xbf16>
    %11 = arith.truncf %9 : vector<128x128xf32> to vector<128x128xbf16>
    %cst_7 = arith.constant dense<0.000000e+00> : vector<64x128xf32>
    %12 = tpu.matmul %10, %11, %cst_7 {dimension_numbers = #tpu.dot_dimension_numbers<[1], [0], [0], [1], [0, 0, 1, 1], [], []>} : vector<64x128xbf16>, vector<128x128xbf16>, vector<64x128xf32> -> vector<64x128xf32>
    %c0_8 = arith.constant 0 : index
    %c0_9 = arith.constant 0 : index
    %13 = vector.load %arg5[%c0_8, %c0_9] : memref<64x1xf32, #tpu.memory_space<vmem>>, vector<64x1xf32>
    %14 = vector.broadcast %13 : vector<64x1xf32> to vector<64x128xf32>
    %15 = arith.addf %12, %14 : vector<64x128xf32>
    %cst_10 = arith.constant 0.000000e+00 : f32
    %16 = vector.broadcast %cst_10 : f32 to vector<64x128xf32>
    %17 = arith.maximumf %15, %16 : vector<64x128xf32>
    %c0_11 = arith.constant 0 : index
    %c0_12 = arith.constant 0 : index
    %18 = vector.load %arg6[%c0_11, %c0_12] : memref<32x64xbf16, #tpu.memory_space<vmem>>, vector<32x64xbf16>
    %19 = arith.truncf %17 : vector<64x128xf32> to vector<64x128xbf16>
    %cst_13 = arith.constant dense<0.000000e+00> : vector<32x128xf32>
    %20 = tpu.matmul %18, %19, %cst_13 {dimension_numbers = #tpu.dot_dimension_numbers<[1], [0], [0], [1], [0, 0, 1, 1], [], []>} : vector<32x64xbf16>, vector<64x128xbf16>, vector<32x128xf32> -> vector<32x128xf32>
    %c0_14 = arith.constant 0 : index
    %c0_15 = arith.constant 0 : index
    %21 = vector.load %arg7[%c0_14, %c0_15] : memref<32x1xf32, #tpu.memory_space<vmem>>, vector<32x1xf32>
    %22 = vector.broadcast %21 : vector<32x1xf32> to vector<32x128xf32>
    %23 = arith.addf %20, %22 : vector<32x128xf32>
    %cst_16 = arith.constant 0.000000e+00 : f32
    %24 = vector.broadcast %cst_16 : f32 to vector<32x128xf32>
    %25 = arith.maximumf %23, %24 : vector<32x128xf32>
    %c0_17 = arith.constant 0 : index
    %c0_18 = arith.constant 0 : index
    %26 = vector.load %arg8[%c0_17, %c0_18] : memref<4x32xbf16, #tpu.memory_space<vmem>>, vector<4x32xbf16>
    %27 = arith.truncf %25 : vector<32x128xf32> to vector<32x128xbf16>
    %cst_19 = arith.constant dense<0.000000e+00> : vector<4x128xf32>
    %28 = tpu.matmul %26, %27, %cst_19 {dimension_numbers = #tpu.dot_dimension_numbers<[1], [0], [0], [1], [0, 0, 1, 1], [], []>} : vector<4x32xbf16>, vector<32x128xbf16>, vector<4x128xf32> -> vector<4x128xf32>
    %c0_20 = arith.constant 0 : index
    %c0_21 = arith.constant 0 : index
    %29 = vector.load %arg9[%c0_20, %c0_21] : memref<4x1xf32, #tpu.memory_space<vmem>>, vector<4x1xf32>
    %30 = vector.broadcast %29 : vector<4x1xf32> to vector<4x128xf32>
    %31 = arith.addf %28, %30 : vector<4x128xf32>
    %c0_22 = arith.constant 0 : index
    %c0_23 = arith.constant 0 : index
    %32 = vector.load %arg10[%c0_22, %c0_23] : memref<4x128xf32, #tpu.memory_space<vmem>>, vector<4x128xf32>
    tpu.vector_store %arg10[%c0_22, %c0_23], %31 {strides = array<i32>} : memref<4x128xf32, #tpu.memory_space<vmem>>, vector<4x128xf32>,
    return
  }
  func.func @transform_0(%arg0: i32) -> (i32, i32) {
    %c0_i32 = arith.constant 0 : i32
    %c0_i32_0 = arith.constant 0 : i32
    return %c0_i32, %arg0 : i32, i32
  }
  func.func @transform_1(%arg0: i32) -> (i32, i32) {
    %c0_i32 = arith.constant 0 : i32
    %c0_i32_0 = arith.constant 0 : i32
    %c0_i32_1 = arith.constant 0 : i32
    return %c0_i32, %c0_i32_0 : i32, i32
  }
  func.func @transform_2(%arg0: i32) -> (i32, i32) {
    %c0_i32 = arith.constant 0 : i32
    %c0_i32_0 = arith.constant 0 : i32
    %c0_i32_1 = arith.constant 0 : i32
    return %c0_i32, %c0_i32_0 : i32, i32
  }
  func.func @transform_3(%arg0: i32) -> (i32, i32) {
    %c0_i32 = arith.constant 0 : i32
    %c0_i32_0 = arith.constant 0 : i32
    %c0_i32_1 = arith.constant 0 : i32
    return %c0_i32, %c0_i32_0 : i32, i32
  }
  func.func @transform_4(%arg0: i32) -> (i32, i32) {
    %c0_i32 = arith.constant 0 : i32
    %c0_i32_0 = arith.constant 0 : i32
    %c0_i32_1 = arith.constant 0 : i32
    return %c0_i32, %c0_i32_0 : i32, i32
  }
  func.func @transform_5(%arg0: i32) -> (i32, i32) {
    %c0_i32 = arith.constant 0 : i32
    %c0_i32_0 = arith.constant 0 : i32
    %c0_i32_1 = arith.constant 0 : i32
    return %c0_i32, %c0_i32_0 : i32, i32
  }
  func.func @transform_6(%arg0: i32) -> (i32, i32) {
    %c0_i32 = arith.constant 0 : i32
    %c0_i32_0 = arith.constant 0 : i32
    %c0_i32_1 = arith.constant 0 : i32
    return %c0_i32, %c0_i32_0 : i32, i32
  }
  func.func @transform_7(%arg0: i32) -> (i32, i32) {
    %c0_i32 = arith.constant 0 : i32
    %c0_i32_0 = arith.constant 0 : i32
    %c0_i32_1 = arith.constant 0 : i32
    return %c0_i32, %c0_i32_0 : i32, i32
  }
  func.func @transform_8(%arg0: i32) -> (i32, i32) {
    %c0_i32 = arith.constant 0 : i32
    %c0_i32_0 = arith.constant 0 : i32
    %c0_i32_1 = arith.constant 0 : i32
    return %c0_i32, %c0_i32_0 : i32, i32
  }
  func.func @transform_9(%arg0: i32) -> (i32, i32) {
    %c0_i32 = arith.constant 0 : i32
    %c0_i32_0 = arith.constant 0 : i32
    return %c0_i32, %arg0 : i32, i32
  }
}

</mosaic_0001>

<bundles_post_ra>
// kernel: tpu_custom_call.1
= control target key start
LH: loop header
LB: loop body
LE: loop exit
PB: predicated region body
PF: predicated region fallthrough
CT: control target
= control target key end

     0   :  { %v723_v2 = vmov 0   ;;  %s968_s0 = inlined_call_operand.vmem [shape: f32[1,128], index: 0, kind: input, shape index: {}]   ;;  %s969_s1 = inlined_call_operand.vmem [shape: f32[128,1], index: 1, kind: input, shape index: {}]   ;;  %s970_s2 = inlined_call_operand.vmem [shape: f32[128,1], index: 2, kind: input, shape index: {}]   ;;  %s971_s3 = inlined_call_operand.vmem [shape: bf16[64,128], index: 3, kind: input, shape index: {}]   ;;  %s972_s4 = inlined_call_operand.vmem [shape: f32[64,1], index: 4, kind: input, shape index: {}]   ;;  %s973_s5 = inlined_call_operand.vmem [shape: bf16[32,64], index: 5, kind: input, shape index: {}]   ;;  %s974_s6 = inlined_call_operand.vmem [shape: f32[32,1], index: 6, kind: input, shape index: {}]   ;;  %s975_s7 = inlined_call_operand.vmem [shape: bf16[4,32], index: 7, kind: input, shape index: {}]   ;;  %s976_s8 = inlined_call_operand.vmem [shape: f32[4,1], index: 8, kind: input, shape index: {}]   ;;  %s977_s9 = inlined_call_operand.hbm [shape: f32[4,128], index: 9, kind: output, shape index: {}]  }
   0x1   :  { %v153_v0 = vld [vmem:[%s970_s2] sm:$0xff]  ;;  %692 = vset.pattern.permute.xlu1 %v723_v2  ;;  %691 = vset.pattern.permute.xlu0 %v723_v2  ;;  %v154_v3 = vld [vmem:[%s970_s2 + $0x8] sm:$0xff]  ;;  %v37_v5 = vld [vmem:[%s969_s1 + $0x18] sm:$0xff] }
   0x2   :  { %v34_v1 = vld [vmem:[%s969_s1] sm:$0xff]  ;;  %171 = vperm.xlu1 %692, %v153_v0   ;;  %v35_v4 = vld [vmem:[%s969_s1 + $0x8] sm:$0xff]  ;;  %v36_v6 = vld [vmem:[%s969_s1 + $0x10] sm:$0xff] }
   0x3   :  { %53 = vperm.xlu0 %691, %v34_v1   ;;  %v156_v7 = vld [vmem:[%s970_s2 + $0x18] sm:$0xff]  ;;  %v155_v8 = vld [vmem:[%s970_s2 + $0x10] sm:$0xff]  ;;  %v39_v9 = vld [vmem:[%s969_s1 + $0x28] sm:$0xff] }
   0x4   :  { %v38_v10 = vld [vmem:[%s969_s1 + $0x20] sm:$0xff]  ;;  %v158_v11 = vld [vmem:[%s970_s2 + $0x28] sm:$0xff] }
   0x5   :  { %v157_v12 = vld [vmem:[%s970_s2 + $0x20] sm:$0xff] }
   0x6   :  { %176 = vperm.xlu1 %692, %v154_v3  }
   0x7   :  { %58 = vperm.xlu0 %691, %v35_v4  }
   0xa   :  { %68 = vperm.xlu1 %692, %v37_v5  }
   0xb   :  { %63 = vperm.xlu0 %691, %v36_v6  }
   0xe   :  { %186 = vperm.xlu1 %692, %v156_v7  }
   0xf   :  { %181 = vperm.xlu0 %691, %v155_v8  }
  0x12   :  { %78 = vperm.xlu1 %692, %v39_v9  }
  0x13   :  { %73 = vperm.xlu0 %691, %v38_v10  }
  0x14   :  { %14 = vsyncpa [#allocation3], 0  ;;  %v41_v13 = vld [vmem:[%s969_s1 + $0x38] sm:$0xff]  ;;  %v40_v14 = vld [vmem:[%s969_s1 + $0x30] sm:$0xff]  ;;  %vm484_vm0 = vcmask 523264   ;;  %vm725_vm1 = vmmov 0  }
  0x15   :  { %v160_v15 = vld [vmem:[%s970_s2 + $0x38] sm:$0xff]  ;;  %v159_v16 = vld [vmem:[%s970_s2 + $0x30] sm:$0xff]  ;;  %v43_v17 = vld [vmem:[%s969_s1 + $0x48] sm:$0xff]  ;;  %vm553_vm2 = vcmask 261120   ;;  %s726_s21 = smov [#allocation2]  }
  0x16   :  { %196 = vperm.xlu1 %692, %v158_v11   ;;  %v42_v18 = vld [vmem:[%s969_s1 + $0x40] sm:$0xff]  ;;  %v162_v19 = vld [vmem:[%s970_s2 + $0x48] sm:$0xff]  ;;  %v45_v21 = vld [vmem:[%s969_s1 + $0x58] sm:$0xff]  ;;  %s604_s22 = sshll.u32 %s726_s21, 4  ;;  %s605_s22 = int_to_ptr.vmem [resolvable:$true] %s604_s22 }
  0x17   :  { %191 = vperm.xlu0 %691, %v157_v12   ;;  %v161_v20 = vld [vmem:[%s970_s2 + $0x40] sm:$0xff]  ;;  %v44_v22 = vld [vmem:[%s969_s1 + $0x50] sm:$0xff]  ;;  %v164_v23 = vld [vmem:[%s970_s2 + $0x58] sm:$0xff]  ;;  %s699_s23 = scalar_lea.vmem %s605_s22, 64  ;;  %p704_p1 = scmp.lt.s32.totalorder %s605_s22, %s605_s22 }
  0x18   :  { %v163_v24 = vld [vmem:[%s970_s2 + $0x50] sm:$0xff]  ;;  %v47_v25 = vld [vmem:[%s969_s1 + $0x68] sm:$0xff]  ;;  %v46_v26 = vld [vmem:[%s969_s1 + $0x60] sm:$0xff]  ;;  %p700_p0 = scmp.ne.s32.totalorder %s605_s22, %s699_s23  ;;  %p705_p2 = scmp.lt.s32.totalorder %s699_s23, %s699_s23 }
  0x19   :  { %v166_v27 = vld [vmem:[%s970_s2 + $0x68] sm:$0xff]  ;;  %v165_v28 = vld [vmem:[%s970_s2 + $0x60] sm:$0xff]  ;;  %v49_v29 = vld [vmem:[%s969_s1 + $0x78] sm:$0xff] }
  0x1a   :  { %88 = vperm.xlu1 %692, %v41_v13   ;;  %v48_v30 = vld [vmem:[%s969_s1 + $0x70] sm:$0xff]  ;;  %v168_v31 = vld [vmem:[%s970_s2 + $0x78] sm:$0xff]  ;;  %v298_v33 = vld [vmem:[%s972_s4 + $0x8] sm:$0xff]  ;;  %p706_p3 = por %p705_p2, %p704_p1 }
  0x1b   :  { %83 = vperm.xlu0 %691, %v40_v14   ;;  %v167_v32 = vld [vmem:[%s970_s2 + $0x70] sm:$0xff]  ;;  %v297_v34 = vld [vmem:[%s972_s4] sm:$0xff]  ;;  %v300_v35 = vld [vmem:[%s972_s4 + $0x18] sm:$0xff] }
  0x1c   :  { %v299_v36 = vld [vmem:[%s972_s4 + $0x10] sm:$0xff]  ;;  %v693_v37 = vld [vmem:[%s971_s3] sm:$0xff]   ;;  %v302_v38 = vld [vmem:[%s972_s4 + $0x28] sm:$0xff]  ;;  %p707_p4 = pnand %p706_p3, %p700_p0 }
  0x1d   :  { %v301_v39 = vld [vmem:[%s972_s4 + $0x20] sm:$0xff]  ;;  %659 = vmatprep.mubr.bf16.mxu0 %v693_v37  ;;  %v304_v40 = vld [vmem:[%s972_s4 + $0x38] sm:$0xff]  ;;  %v303_v41 = vld [vmem:[%s972_s4 + $0x30] sm:$0xff] }
  0x1e   :  { %206 = vperm.xlu1 %692, %v160_v15   ;;  %v451_v42 = vld [vmem:[%s974_s6 + $0x8] sm:$0xff]  ;;  %v450_v43 = vld [vmem:[%s974_s6] sm:$0xff]  ;;  %v453_v44 = vld [vmem:[%s974_s6 + $0x18] sm:$0xff] }
  0x1f   :  { %201 = vperm.xlu0 %691, %v159_v16   ;;  %v452_v45 = vld [vmem:[%s974_s6 + $0x10] sm:$0xff]  ;;  %v547_v46 = vld [vmem:[%s976_s8] sm:$0xf] }
  0x20   :  { %v918_v47 = vld [vmem:[%s968_s0] ss:$0 sm:$0xff] }
  0x22   :  { %98 = vperm.xlu1 %692, %v43_v17  }
  0x23   :  { %93 = vperm.xlu0 %691, %v42_v18  }
  0x26   :  { %216 = vperm.xlu1 %692, %v162_v19  }
  0x27   :  { %211 = vperm.xlu0 %691, %v161_v20  }
  0x2a   :  { %108 = vperm.xlu1 %692, %v45_v21  }
  0x2b   :  { %103 = vperm.xlu0 %691, %v44_v22  }
  0x2e   :  { %226 = vperm.xlu1 %692, %v164_v23  }
  0x2f   :  { %221 = vperm.xlu0 %691, %v163_v24  }
  0x32   :  { %118 = vperm.xlu1 %692, %v47_v25  }
  0x33   :  { %113 = vperm.xlu0 %691, %v46_v26  }
  0x36   :  { %236 = vperm.xlu1 %692, %v166_v27  }
  0x37   :  { %231 = vperm.xlu0 %691, %v165_v28  }
  0x3a   :  { %128 = vperm.xlu1 %692, %v49_v29  }
  0x3b   :  { %123 = vperm.xlu0 %691, %v48_v30  }
  0x3e   :  { %246 = vperm.xlu1 %692, %v168_v31  }
  0x3f   :  { %241 = vperm.xlu0 %691, %v167_v32  }
  0x42   :  { %312 = vperm.xlu1 %692, %v298_v33  }
  0x43   :  { %307 = vperm.xlu0 %691, %v297_v34  }
  0x46   :  { %322 = vperm.xlu1 %692, %v300_v35  }
  0x47   :  { %317 = vperm.xlu0 %691, %v299_v36  }
  0x4a   :  { %332 = vperm.xlu1 %692, %v302_v38  }
  0x4b   :  { %327 = vperm.xlu0 %691, %v301_v39  }
  0x4e   :  { %342 = vperm.xlu1 %692, %v304_v40  }
  0x4f   :  { %337 = vperm.xlu0 %691, %v303_v41  }
  0x52   :  { %461 = vperm.xlu1 %692, %v451_v42  }
  0x53   :  { %456 = vperm.xlu0 %691, %v450_v43  }
  0x56   :  { %471 = vperm.xlu1 %692, %v453_v44  }
  0x57   :  { %466 = vperm.xlu0 %691, %v452_v45  }
  0x5b   :  { %550 = vperm.xlu0 %691, %v547_v46  }
  0x81   :  { %v172_v48 = vpop.permute.xlu1 %171 }
  0x82   :  { %v54_v49 = vpop.permute.xlu0 %53 }
  0x83   :  { %v137_v50 = vmul.f32 %v918_v47, %v54_v49 }
  0x85   :  { %v177_v51 = vpop.permute.xlu1 %176  ;;  %v249_v53 = vadd.f32 %v172_v48, %v137_v50 }
  0x86   :  { %v59_v52 = vpop.permute.xlu0 %58 }
  0x87   :  { %v138_v54 = vmul.f32 %v918_v47, %v59_v52  ;;  %v265_v58 = vmax.f32 %v249_v53, 0.0 }
  0x89   :  { %v250_v55 = vadd.f32 %v177_v51, %v138_v54  ;;  %v69_v56 = vpop.permute.xlu1 %68 }
  0x8a   :  { %v64_v57 = vpop.permute.xlu0 %63  ;;  %v140_v60 = vmul.f32 %v918_v47, %v69_v56 }
  0x8b   :  { %v266_v59 = vmax.f32 %v250_v55, 0.0  ;;  %v139_v61 = vmul.f32 %v918_v47, %v64_v57 }
  0x8d   :  { %v289_v62 = vpack.c.bf16 %v266_v59, %v265_v58  ;;  %v187_v63 = vpop.permute.xlu1 %186 }
  0x8e   :  { %v182_v0 = vpop.permute.xlu0 %181  ;;  %v252_v1 = vadd.f32 %v187_v63, %v140_v60 }
  0x8f   :  { %v251_v2 = vadd.f32 %v182_v0, %v139_v61  ;;  %643 = vmatprep.subr.bf16.mxu0 %v289_v62 }
  0x90   :  { %644 = vmatpush3.bf16.msra.mxu0 %v289_v62  ;;  %v268_v3 = vmax.f32 %v252_v1, 0.0 }
  0x91   :  { %v267_v4 = vmax.f32 %v251_v2, 0.0  ;;  %v79_v5 = vpop.permute.xlu1 %78 }
  0x92   :  { %v74_v6 = vpop.permute.xlu0 %73  ;;  %v142_v8 = vmul.f32 %v918_v47, %v79_v5 }
  0x93   :  { %v290_v7 = vpack.c.bf16 %v268_v3, %v267_v4  ;;  %v141_v9 = vmul.f32 %v918_v47, %v74_v6 }
  0x95   :  { %645 = vmatprep.subr.bf16.mxu0 %v290_v7  ;;  %v197_v10 = vpop.permute.xlu1 %196 }
  0x96   :  { %646 = vmatpush3.bf16.msra.mxu0 %v290_v7  ;;  %v192_v11 = vpop.permute.xlu0 %191  ;;  %v254_v12 = vadd.f32 %v197_v10, %v142_v8  ;;  %v695_v10 = vld [vmem:[%s971_s3 + $0x10] sm:$0xff]  }
  0x97   :  { %v253_v13 = vadd.f32 %v192_v11, %v141_v9  ;;  %v694_v9 = vld [vmem:[%s971_s3 + $0x8] sm:$0xff]   ;;  %v697_v11 = vld [vmem:[%s973_s5] sm:$0xff]  }
  0x98   :  { %v270_v14 = vmax.f32 %v254_v12, 0.0  ;;  %675 = vmatprep.mubr.msk.bf16.mxu1 %vm484_vm0, %v697_v11 }
  0x99   :  { %v269_v15 = vmax.f32 %v253_v13, 0.0  ;;  %v89_v16 = vpop.permute.xlu1 %88 }
  0x9a   :  { %v84_v17 = vpop.permute.xlu0 %83  ;;  %v144_v19 = vmul.f32 %v918_v47, %v89_v16 }
  0x9b   :  { %v291_v18 = vpack.c.bf16 %v270_v14, %v269_v15  ;;  %v143_v20 = vmul.f32 %v918_v47, %v84_v17 }
  0x9d   :  { %647 = vmatprep.subr.bf16.mxu0 %v291_v18  ;;  %v207_v21 = vpop.permute.xlu1 %206 }
  0x9e   :  { %648 = vmatpush3.bf16.msra.mxu0 %v291_v18  ;;  %v202_v22 = vpop.permute.xlu0 %201  ;;  %v256_v23 = vadd.f32 %v207_v21, %v144_v19 }
  0x9f   :  { %v255_v24 = vadd.f32 %v202_v22, %v143_v20 }
  0xa0   :  { %v272_v25 = vmax.f32 %v256_v23, 0.0 }
  0xa1   :  { %v271_v26 = vmax.f32 %v255_v24, 0.0  ;;  %v99_v27 = vpop.permute.xlu1 %98 }
  0xa2   :  { %v94_v28 = vpop.permute.xlu0 %93  ;;  %v146_v30 = vmul.f32 %v918_v47, %v99_v27 }
  0xa3   :  { %v292_v29 = vpack.c.bf16 %v272_v25, %v271_v26  ;;  %v145_v31 = vmul.f32 %v918_v47, %v94_v28 }
  0xa5   :  { %649 = vmatprep.subr.bf16.mxu0 %v292_v29  ;;  %v217_v32 = vpop.permute.xlu1 %216 }
  0xa6   :  { %650 = vmatpush3.bf16.msra.mxu0 %v292_v29  ;;  %v212_v33 = vpop.permute.xlu0 %211  ;;  %v258_v34 = vadd.f32 %v217_v32, %v146_v30 }
  0xa7   :  { %v257_v35 = vadd.f32 %v212_v33, %v145_v31 }
  0xa8   :  { %v274_v36 = vmax.f32 %v258_v34, 0.0 }
  0xa9   :  { %v273_v37 = vmax.f32 %v257_v35, 0.0  ;;  %v109_v38 = vpop.permute.xlu1 %108 }
  0xaa   :  { %v104_v39 = vpop.permute.xlu0 %103  ;;  %v148_v41 = vmul.f32 %v918_v47, %v109_v38 }
  0xab   :  { %v293_v40 = vpack.c.bf16 %v274_v36, %v273_v37  ;;  %v147_v42 = vmul.f32 %v918_v47, %v104_v39 }
  0xad   :  { %651 = vmatprep.subr.bf16.mxu0 %v293_v40  ;;  %v227_v43 = vpop.permute.xlu1 %226 }
  0xae   :  { %652 = vmatpush3.bf16.msra.mxu0 %v293_v40  ;;  %v222_v44 = vpop.permute.xlu0 %221  ;;  %v260_v45 = vadd.f32 %v227_v43, %v148_v41 }
  0xaf   :  { %v259_v46 = vadd.f32 %v222_v44, %v147_v42 }
  0xb0   :  { %v276_v48 = vmax.f32 %v260_v45, 0.0 }
  0xb1   :  { %v275_v49 = vmax.f32 %v259_v46, 0.0  ;;  %v119_v50 = vpop.permute.xlu1 %118 }
  0xb2   :  { %v114_v51 = vpop.permute.xlu0 %113  ;;  %v150_v53 = vmul.f32 %v918_v47, %v119_v50  ;;  %v724_v50 = vmov 0.0  }
  0xb3   :  { %v294_v52 = vpack.c.bf16 %v276_v48, %v275_v49  ;;  %v149_v54 = vmul.f32 %v918_v47, %v114_v51  ;;  %v698_v49 = vld [vmem:[%s973_s5 + $0x8] sm:$0xff]  }
  0xb5   :  { %653 = vmatprep.subr.bf16.mxu0 %v294_v52  ;;  %v237_v55 = vpop.permute.xlu1 %236 }
  0xb6   :  { %654 = vmatpush3.bf16.msra.mxu0 %v294_v52  ;;  %v232_v56 = vpop.permute.xlu0 %231  ;;  %v262_v57 = vadd.f32 %v237_v55, %v150_v53 }
  0xb7   :  { %v261_v58 = vadd.f32 %v232_v56, %v149_v54 }
  0xb8   :  { %v278_v59 = vmax.f32 %v262_v57, 0.0 }
  0xb9   :  { %v277_v60 = vmax.f32 %v261_v58, 0.0  ;;  %v129_v61 = vpop.permute.xlu1 %128 }
  0xba   :  { %v124_v62 = vpop.permute.xlu0 %123  ;;  %v152_v0 = vmul.f32 %v918_v47, %v129_v61 }
  0xbb   :  { %v295_v63 = vpack.c.bf16 %v278_v59, %v277_v60  ;;  %v151_v1 = vmul.f32 %v918_v47, %v124_v62  ;;  %v696_v47 = vld [vmem:[%s971_s3 + $0x18] sm:$0xff]  }
  0xbd   :  { %655 = vmatprep.subr.bf16.mxu0 %v295_v63  ;;  %v247_v2 = vpop.permute.xlu1 %246 }
  0xbe   :  { %656 = vmatpush3.bf16.msra.mxu0 %v295_v63  ;;  %v242_v3 = vpop.permute.xlu0 %241  ;;  %v264_v4 = vadd.f32 %v247_v2, %v152_v0 }
  0xbf   :  { %v263_v5 = vadd.f32 %v242_v3, %v151_v1 }
  0xc0   :  { %v280_v6 = vmax.f32 %v264_v4, 0.0 }
  0xc1   :  { %v279_v7 = vmax.f32 %v263_v5, 0.0  ;;  %v313_v13 = vpop.permute.xlu1 %312  ;;  %v544_v5 = vld [vmem:[%s975_s7] sm:$0x3] }
  0xc2   :  { %v308_v12 = vpop.permute.xlu0 %307 }
  0xc3   :  { %v296_v8 = vpack.c.bf16 %v280_v6, %v279_v7 }
  0xc5   :  { %657 = vmatprep.subr.bf16.mxu0 %v296_v8  ;;  %v323_v15 = vpop.permute.xlu1 %322 }
  0xc6   :  { %658 = vmatpush3.bf16.msra.mxu0 %v296_v8  ;;  %v318_v14 = vpop.permute.xlu0 %317 }
  0xc9   :  { %660 = vmatmul.mubr.bf16.vlgmr.msra.gmra.mrb[0].mxu0 %v694_v9  ;;  %v333_v24 = vpop.permute.xlu1 %332 }
  0xca   :  { %663 = vmatprep.mubr.bf16.mxu0 %v695_v10  ;;  %v328_v19 = vpop.permute.xlu0 %327 }
  0xcd   :  { %v343_v36 = vpop.permute.xlu1 %342 }
  0xce   :  { %v338_v31 = vpop.permute.xlu0 %337 }
  0xd1   :  { %664 = vmatmul.mubr.bf16.gmra.mrb[4].mxu0 %v696_v47  ;;  %v462_v52 = vpop.permute.xlu1 %461 }
  0xd2   :  { %v457_v51 = vpop.permute.xlu0 %456 }
  0xd5   :  { %v472_v57 = vpop.permute.xlu1 %471 }
  0xd6   :  { %v467_v53 = vpop.permute.xlu0 %466 }
  0xda   :  { %v551_v6 = vpop.permute.xlu0 %550 }
 0x19c   :  { %v661_v16 = vpop.f32.mrb[0].mxu0 }
 0x19d   :  { %v412_v17 = vadd.f32 %v661_v16, %v318_v14  ;;  %v403_v18 = vpop.f32.mrb[1].mxu0 }
 0x19e   :  { %v404_v20 = vadd.f32 %v403_v18, %v308_v12  ;;  %v662_v21 = vpop.f32.mrb[2].mxu0 }
 0x19f   :  { %v415_v22 = vadd.f32 %v662_v21, %v323_v15  ;;  %v406_v23 = vpop.f32.mrb[3].mxu0  ;;  %v436_v26 = vmax.f32 %v412_v17, 0.0 }
 0x1a0   :  { %v407_v25 = vadd.f32 %v406_v23, %v313_v13  ;;  %v434_v28 = vmax.f32 %v404_v20, 0.0 }
 0x1a1   :  { %v437_v27 = vmax.f32 %v415_v22, 0.0 }
 0x1a2   :  { %v435_v29 = vmax.f32 %v407_v25, 0.0 }
 0x1a3   :  { %v447_v30 = vpack.c.bf16 %v437_v27, %v436_v26 }
 0x1a4   :  { %v665_v32 = vpop.f32.mrb[4].mxu0  ;;  %v446_v33 = vpack.c.bf16 %v435_v29, %v434_v28 }
 0x1a5   :  { %v428_v34 = vadd.f32 %v665_v32, %v338_v31  ;;  %v419_v35 = vpop.f32.mrb[5].mxu0 }
 0x1a6   :  { %v420_v37 = vadd.f32 %v419_v35, %v328_v19  ;;  %v666_v38 = vpop.f32.mrb[6].mxu0  ;;  %667 = vmatprep.subr.bf16.mxu1 %v446_v33 }
 0x1a7   :  { %v431_v39 = vadd.f32 %v666_v38, %v343_v36  ;;  %v422_v40 = vpop.f32.mrb[7].mxu0  ;;  %668 = vmatpush3.bf16.msra.mxu1 %v446_v33  ;;  %v440_v42 = vmax.f32 %v428_v34, 0.0 }
 0x1a8   :  { %v423_v41 = vadd.f32 %v422_v40, %v333_v24  ;;  %669 = vmatprep.subr.bf16.mxu1 %v447_v30  ;;  %v438_v44 = vmax.f32 %v420_v37, 0.0 }
 0x1a9   :  { %v441_v43 = vmax.f32 %v431_v39, 0.0 }
 0x1aa   :  { %v439_v45 = vmax.f32 %v423_v41, 0.0 }
 0x1ab   :  { %v449_v46 = vpack.c.bf16 %v441_v43, %v440_v42  ;;  %670 = vmatpush3.bf16.msra.mxu1 %v447_v30 }
 0x1ac   :  { %v448_v48 = vpack.c.bf16 %v439_v45, %v438_v44 }
 0x1ae   :  { %671 = vmatprep.subr.bf16.mxu1 %v448_v48 }
 0x1af   :  { %672 = vmatpush3.bf16.msra.mxu1 %v448_v48 }
 0x1b0   :  { %673 = vmatprep.subr.bf16.mxu1 %v449_v46 }
 0x1b3   :  { %674 = vmatpush3.bf16.msra.mxu1 %v449_v46 }
 0x1b4   :  { %679 = vmatprep.subr.bf16.mxu1 %v724_v50 }
 0x1b6   :  { %676 = vmatmul.mubr.msk.bf16.vlgmr.msra.gmra.mrb[0].mxu1 %vm484_vm0, %v698_v49 }
 0x1b7   :  { %683 = vmatprep.mubr.msk.bf16.mxu1 %vm725_vm1, %v724_v50 }
 0x289   :  { %v677_v54 = vpop.f32.mrb[0].mxu1 }
 0x28a   :  { %v534_v55 = vadd.f32 %v677_v54, %v467_v53  ;;  %v525_v56 = vpop.f32.mrb[1].mxu1 }
 0x28b   :  { %v526_v58 = vadd.f32 %v525_v56, %v457_v51  ;;  %v678_v59 = vpop.f32.mrb[2].mxu1 }
 0x28c   :  { %v537_v60 = vadd.f32 %v678_v59, %v472_v57  ;;  %v528_v61 = vpop.f32.mrb[3].mxu1  ;;  %v542_v63 = vmax.f32 %v534_v55, 0.0 }
 0x28d   :  { %v529_v62 = vadd.f32 %v528_v61, %v462_v52  ;;  %v540_v1 = vmax.f32 %v526_v58, 0.0 }
 0x28e   :  { %v543_v0 = vmax.f32 %v537_v60, 0.0 }
 0x28f   :  { %v541_v2 = vmax.f32 %v529_v62, 0.0 }
 0x290   :  { %v546_v3 = vpack.c.bf16 %v543_v0, %v542_v63 }
 0x291   :  { %v545_v4 = vpack.c.bf16 %v541_v2, %v540_v1 }
 0x293   :  { %680 = vmatpush3.bf16.msra.mxu1 %v545_v4 }
 0x294   :  { %681 = vmatprep.subr.bf16.mxu1 %v724_v50 }
 0x297   :  { %682 = vmatpush3.bf16.msra.mxu1 %v546_v3 }
 0x29a   :  { %684 = vmatmul.mubr.msk.bf16.vlgmr.msra.gmra.mrb[4].mxu1 %vm553_vm2, %v544_v5 }
 0x36d   :  { %v591_v7 = vpop.f32.mrb[4].mxu1 }
 0x36e   :  { %v592_v8 = vadd.f32 %v591_v7, %v551_v6  ;;  %v685_v9 = vpop.f32.mrb[5].mxu1 }
 0x36f   :  { %v594_v10 = vpop.f32.mrb[6].mxu1 }
 0x370   :  { %597 = vst [vmem:[#allocation2] sm:$0xf] %v592_v8  ;;  %v686_v47 = vpop.f32.mrb[7].mxu1 }
 0x371   :  { %710 = shalt.err (!%p707_p4)
}
 0x372   :  { %s711_s25 = scalar_lea.hbm %s977_s9, 64 }
 0x373   :  { %p712_p5 = scmp.ne.s32.totalorder %s977_s9, %s711_s25  ;;  %p715_p6 = scmp.lt.u32.totalorder %s711_s25, %s977_s9 }
 0x375   :  { %p717_p7 = pnand %p715_p6, %p712_p5 }
 0x377   :  { %720 = shalt.err (!%p717_p7)
}
 0x378   :  { %607 = dma.vmem_to_hbm [thread:$0]  %s605_s22, 64, %s977_s9, [#allocation3]  }
 0x379   :  { %721 = dma.done.wait [#allocation3], 64  }
 0x37a   :  { %722 = vsyncadd [#allocation3], 4294967232 }
 0x37b   :  { %611 = vsyncpa [#allocation3], 1 }

</bundles_post_ra>
